<compile_context>
chip_gen: v7x
topology: tpu7x:2x2x1
jax: 0.10.0
libtpu: 0.0.40
codegen_flags: <defaults>
</compile_context>

<pallas_src>
import jax
import jax.numpy as jnp
from jax import lax
from jax.experimental import pallas as pl
from jax.experimental.pallas import tpu as pltpu

BN_EPS = 1e-5
CP = 128                       # padded channel width (lane-dense)
TILE_V = 1024                  # vertex row tile == adjacency reduction tile
MIN_TILE_V = 256
NUMN = 512
NUMN2 = 256
HEAD_ORDER = ['style', 'sem', 'func', 'aes']
HEAD_DIMS = [3, 2, 4, 5]


def round_up(x, m):
    return ((x + m - 1) // m) * m


def pad_to(x, shape):
    return jnp.pad(x, [(0, s - d) for s, d in zip(shape, x.shape)])


def _vmem_limit_bytes():
    # v7x: 64 MiB VMEM / TC; v5e/v6e: 128 MiB. Derive the scoped limit from
    # the actual chip; fall back when there is no TPU (e.g. interpret mode).
    try:
        cap = int(pltpu.get_tpu_info().vmem_capacity_bytes)
        return min(cap * 3 // 4, 100 * 1024 * 1024)
    except Exception:
        return 64 * 1024 * 1024


def _cparams(sem=None):
    if sem is None:
        return pltpu.CompilerParams(vmem_limit_bytes=_vmem_limit_bytes())
    return pltpu.CompilerParams(dimension_semantics=sem,
                                vmem_limit_bytes=_vmem_limit_bytes())


# ----------------------------------------------------------------------------
# Kernel 1: row-tiled fused linear  h01 = x @ [W0|W1] + [b0|b1]
#   outputs: h0 in f32 (accumulator seed), h1 in bf16 (streamed into agg).
# ----------------------------------------------------------------------------
def xw01_kernel(x_ref, w_ref, b_ref, h0_ref, h1_ref):
    h01 = (jnp.dot(x_ref[...], w_ref[...], preferred_element_type=jnp.float32)
           + b_ref[...])
    h0_ref[...] = h01[:, :CP]
    h1_ref[...] = h01[:, CP:].astype(jnp.bfloat16)


def xw01(x, w01, b01, tm):
    vp, cin = x.shape
    n_i = vp // tm
    return pl.pallas_call(
        xw01_kernel,
        out_shape=(jax.ShapeDtypeStruct((vp, CP), jnp.float32),
                   jax.ShapeDtypeStruct((vp, CP), jnp.bfloat16)),
        grid_spec=pltpu.PrefetchScalarGridSpec(
            num_scalar_prefetch=0,
            grid=(n_i,),
            in_specs=[pl.BlockSpec((tm, cin), lambda i: (i, 0)),
                      pl.BlockSpec((cin, 2 * CP), lambda i: (0, 0)),
                      pl.BlockSpec((1, 2 * CP), lambda i: (0, 0))],
            out_specs=(pl.BlockSpec((tm, CP), lambda i: (i, 0)),
                       pl.BlockSpec((tm, CP), lambda i: (i, 0)))),
        compiler_params=_cparams(("parallel",)),
    )(x, w01, b01)


# ----------------------------------------------------------------------------
# Kernel 2: block-sparse tiled neighbor aggregation + BN partial statistics
#   pre[i] = h0[i] + sum_{active k} A[i,k] @ h1[k]   (bf16 x bf16 -> f32 acc)
#   stats[i] = [sum_rows(pre[i] masked), sum_rows(pre[i]^2 masked)]
# Per-row-tile active-k table / counts arrive via scalar prefetch and drive
# data-dependent index_maps so all-zero adjacency tiles are skipped.
# ----------------------------------------------------------------------------
def make_agg_kernel(v_actual, tm):
    def kernel(cnt_ref, tbl_ref, adj_ref, h1_ref, h0_ref,
               pre_ref, stats_ref, acc_ref):
        # Grid indices read ONCE at top level (never inside a pl.when body).
        i = pl.program_id(0)
        k = pl.program_id(1)
        n_k = pl.num_programs(1)
        row_base = i * tm
        n_active = cnt_ref[i]

        @pl.when(k == 0)
        def _init():
            acc_ref[...] = h0_ref[...]

        @pl.when(k < n_active)            # skip padded (all-zero) adj tiles
        def _accum():
            acc_ref[...] += jnp.dot(adj_ref[...], h1_ref[...],
                                    preferred_element_type=jnp.float32)

        @pl.when(k == n_k - 1)
        def _finalize():
            pre = acc_ref[...]
            pre_ref[...] = pre.astype(jnp.bfloat16)
            # mask padded vertex rows out of the BN statistics
            row = row_base + lax.broadcasted_iota(jnp.int32, (tm, 1), 0)
            valid = (row < v_actual).astype(jnp.float32)
            pv = pre * valid
            part = jnp.concatenate(
                [jnp.sum(pv, axis=0, keepdims=True),
                 jnp.sum(pv * pre, axis=0, keepdims=True)], axis=0)
            stats_ref[...] = part[None, :, :]
    return kernel


def agg_stats(tile_cnt, tile_tbl, adj, h1b, h0f, tm, tk, v_actual, n_k_active):
    vp = adj.shape[0]
    n_i = vp // tm

    def active_tile(i, k, cnt_ref, tbl_ref):
        # For k >= cnt[i] clamp to the last active tile: the DMA is a revisit
        # of the same block and its matmul is skipped via pl.when.
        kk = jnp.minimum(k, jnp.maximum(cnt_ref[i] - 1, 0))
        return tbl_ref[i * n_k_active + kk]

    adj_map = lambda i, k, c, t: (i, active_tile(i, k, c, t))
    h1_map = lambda i, k, c, t: (active_tile(i, k, c, t), 0)

    return pl.pallas_call(
        make_agg_kernel(v_actual, tm),
        out_shape=(jax.ShapeDtypeStruct((vp, CP), jnp.bfloat16),
                   jax.ShapeDtypeStruct((n_i, 2, CP), jnp.float32)),
        grid_spec=pltpu.PrefetchScalarGridSpec(
            num_scalar_prefetch=2,
            grid=(n_i, n_k_active),
            in_specs=[pl.BlockSpec((tm, tk), adj_map),               # adj bf16
                      pl.BlockSpec((tk, CP), h1_map),                # h1 bf16
                      pl.BlockSpec((tm, CP), lambda i, k, c, t: (i, 0))],
            out_specs=(pl.BlockSpec((tm, CP), lambda i, k, c, t: (i, 0)),
                       pl.BlockSpec((1, 2, CP), lambda i, k, c, t: (i, 0, 0))),
            scratch_shapes=[pltpu.VMEM((tm, CP), jnp.float32)]),
        compiler_params=_cparams(("parallel", "arbitrary")),
    )(tile_cnt, tile_tbl, adj, h1b, h0f)


# ----------------------------------------------------------------------------
# Kernel 3a: BN (from global sum/sumsq) + ReLU fused with next layer x@[W0|W1]
# ----------------------------------------------------------------------------
def make_bn_relu_xw_kernel(v_actual):
    inv_n = 1.0 / float(v_actual)

    def kernel(pre_ref, stats_ref, gamma_ref, beta_ref, w_ref, b_ref,
               h0_ref, h1_ref):
        pre = pre_ref[...].astype(jnp.float32)
        mean = stats_ref[0:1, :] * inv_n
        var = jnp.maximum(stats_ref[1:2, :] * inv_n - mean * mean, 0.0)
        h = jnp.maximum((pre - mean) * lax.rsqrt(var + BN_EPS)
                        * gamma_ref[...] + beta_ref[...], 0.0)
        h01 = (jnp.dot(h, w_ref[...], preferred_element_type=jnp.float32)
               + b_ref[...])
        h0_ref[...] = h01[:, :CP]
        h1_ref[...] = h01[:, CP:].astype(jnp.bfloat16)
    return kernel


def bn_relu_xw01(pre, stats, gamma, beta, w01, b01, v_actual, tm):
    vp = pre.shape[0]
    n_i = vp // tm
    return pl.pallas_call(
        make_bn_relu_xw_kernel(v_actual),
        out_shape=(jax.ShapeDtypeStruct((vp, CP), jnp.float32),
                   jax.ShapeDtypeStruct((vp, CP), jnp.bfloat16)),
        grid_spec=pltpu.PrefetchScalarGridSpec(
            num_scalar_prefetch=0,
            grid=(n_i,),
            in_specs=[pl.BlockSpec((tm, CP), lambda i: (i, 0)),
                      pl.BlockSpec((2, CP), lambda i: (0, 0)),
                      pl.BlockSpec((1, CP), lambda i: (0, 0)),
                      pl.BlockSpec((1, CP), lambda i: (0, 0)),
                      pl.BlockSpec((CP, 2 * CP), lambda i: (0, 0)),
                      pl.BlockSpec((1, 2 * CP), lambda i: (0, 0))],
            out_specs=(pl.BlockSpec((tm, CP), lambda i: (i, 0)),
                       pl.BlockSpec((tm, CP), lambda i: (i, 0)))),
        compiler_params=_cparams(("parallel",)),
    )(pre, stats, gamma, beta, w01, b01)


# ----------------------------------------------------------------------------
# Kernel 3b (last layer): BN + ReLU + per-mesh mean pooling, with fc1 + all
# four classifier heads executed in the final grid step (single lane-dense
# (B8, 128) output; wrapper slices the per-head logits).
# ----------------------------------------------------------------------------
def make_pool_heads_kernel(v_actual):
    inv_n = 1.0 / float(v_actual)

    def kernel(pre_ref, stats_ref, gamma_ref, beta_ref, pool_ref,
               fc1w_ref, fc1b_ref, w1_ref, b1_ref, w2_ref, b2_ref,
               out_ref, pooled_ref):
        i = pl.program_id(0)
        n_i = pl.num_programs(0)

        pre = pre_ref[...].astype(jnp.float32)
        mean = stats_ref[0:1, :] * inv_n
        var = jnp.maximum(stats_ref[1:2, :] * inv_n - mean * mean, 0.0)
        h = jnp.maximum((pre - mean) * lax.rsqrt(var + BN_EPS)
                        * gamma_ref[...] + beta_ref[...], 0.0)
        contrib = jnp.dot(pool_ref[...], h, preferred_element_type=jnp.float32)

        @pl.when(i == 0)
        def _init():
            pooled_ref[...] = jnp.zeros_like(pooled_ref)

        pooled_ref[...] += contrib

        @pl.when(i == n_i - 1)
        def _heads():
            feat = jnp.maximum(
                jnp.dot(pooled_ref[...], fc1w_ref[...],
                        preferred_element_type=jnp.float32) + fc1b_ref[...],
                0.0)
            t = jnp.maximum(
                jnp.dot(feat, w1_ref[...],
                        preferred_element_type=jnp.float32) + b1_ref[...], 0.0)
            out_ref[...] = (
                jnp.dot(t, w2_ref[...], preferred_element_type=jnp.float32)
                + b2_ref[...])
    return kernel


def bn_relu_pool_heads(pre, stats, gamma, beta, pool_mat, pparams, v_actual, tm):
    vp = pre.shape[0]
    b8 = pool_mat.shape[0]
    n_i = vp // tm
    numn = pparams['fc1_w'].shape[1]
    numh = pparams['w1cat'].shape[1]
    return pl.pallas_call(
        make_pool_heads_kernel(v_actual),
        out_shape=jax.ShapeDtypeStruct((b8, CP), jnp.float32),
        grid_spec=pltpu.PrefetchScalarGridSpec(
            num_scalar_prefetch=0,
            grid=(n_i,),
            in_specs=[pl.BlockSpec((tm, CP), lambda i: (i, 0)),
                      pl.BlockSpec((2, CP), lambda i: (0, 0)),
                      pl.BlockSpec((1, CP), lambda i: (0, 0)),
                      pl.BlockSpec((1, CP), lambda i: (0, 0)),
                      pl.BlockSpec((b8, tm), lambda i: (0, i)),
                      pl.BlockSpec((CP, numn), lambda i: (0, 0)),
                      pl.BlockSpec((1, numn), lambda i: (0, 0)),
                      pl.BlockSpec((numn, numh), lambda i: (0, 0)),
                      pl.BlockSpec((1, numh), lambda i: (0, 0)),
                      pl.BlockSpec((numh, CP), lambda i: (0, 0)),
                      pl.BlockSpec((1, CP), lambda i: (0, 0))],
            out_specs=pl.BlockSpec((b8, CP), lambda i: (0, 0)),
            scratch_shapes=[pltpu.VMEM((b8, CP), jnp.float32)]),
        compiler_params=_cparams(("arbitrary",)),
    )(pre, stats, gamma, beta, pool_mat,
      pparams['fc1_w'], pparams['fc1_b'],
      pparams['w1cat'], pparams['b1cat'],
      pparams['w2blk'], pparams['b2cat'])


# ----------------------------------------------------------------------------
# Parameter init (normal(0, 0.01) weights, zero biases, GraphConv init='normal',
# BatchNorm1d gamma=1 beta=0). Weights are stored (in, out).
# ----------------------------------------------------------------------------
def linear_params(key, din, dout):
    w = 0.01 * jax.random.normal(key, (din, dout), dtype=jnp.float32)
    b = jnp.zeros((1, dout), dtype=jnp.float32)
    return w, b


def init_params(key, dims, numn=NUMN, numn2=NUMN2):
    params = {'gconv': []}
    for i in range(len(dims) - 1):
        key, k0, k1 = jax.random.split(key, 3)
        w0, b0 = linear_params(k0, dims[i], dims[i + 1])
        w1, b1 = linear_params(k1, dims[i], dims[i + 1])
        gamma = jnp.ones((1, dims[i + 1]), dtype=jnp.float32)
        beta = jnp.zeros((1, dims[i + 1]), dtype=jnp.float32)
        params['gconv'].append((w0, b0, w1, b1, gamma, beta))

    key, kfc1 = jax.random.split(key)
    params['fc1_w'], params['fc1_b'] = linear_params(kfc1, dims[-1], numn)
    head_dims = dict(zip(HEAD_ORDER, HEAD_DIMS))
    for name, dout in head_dims.items():
        key, ka, kb = jax.random.split(key, 3)
        params[f'{name}1_w'], params[f'{name}1_b'] = linear_params(ka, numn, numn2)
        params[f'{name}2_w'], params[f'{name}2_b'] = linear_params(kb, numn2, dout)
    return params


def prepare_params(params):
    """Build padded / fused weight layouts consumed by the Pallas kernels."""
    p = {'gconv': []}
    for (w0, b0, w1, b1, gamma, beta) in params['gconv']:
        assert w0.shape[0] <= CP and w0.shape[1] <= CP
        w01 = jnp.concatenate([pad_to(w0, (CP, CP)), pad_to(w1, (CP, CP))], axis=1)
        b01 = jnp.concatenate([pad_to(b0, (1, CP)), pad_to(b1, (1, CP))], axis=1)
        p['gconv'].append({
            'w01': w01, 'b01': b01,
            # gamma padded with zeros -> padded channels stay exactly 0
            'gamma': pad_to(gamma, (1, CP)),
            'beta': pad_to(beta, (1, CP)),
        })

    p['fc1_w'] = pad_to(params['fc1_w'], (CP, NUMN))
    p['fc1_b'] = params['fc1_b']
    p['w1cat'] = jnp.concatenate([params[f'{n}1_w'] for n in HEAD_ORDER], axis=1)
    p['b1cat'] = jnp.concatenate([params[f'{n}1_b'] for n in HEAD_ORDER], axis=1)

    w2blk = jnp.zeros((4 * NUMN2, CP), jnp.float32)
    b2cat = jnp.zeros((1, CP), jnp.float32)
    off = 0
    for idx, (name, d) in enumerate(zip(HEAD_ORDER, HEAD_DIMS)):
        w2blk = w2blk.at[idx * NUMN2:(idx + 1) * NUMN2, off:off + d].set(
            params[f'{name}2_w'])
        b2cat = b2cat.at[:, off:off + d].set(params[f'{name}2_b'])
        off += d
    p['w2blk'] = w2blk
    p['b2cat'] = b2cat
    return p


# ----------------------------------------------------------------------------
# Full forward. Glue builds the padded bf16 adjacency, its block-sparse tile
# table and the pooling matrix; all hot paths run as tiled Pallas kernels.
# ----------------------------------------------------------------------------
def graph_conv_clf3_forward(verts, edges, mesh_idx, num_meshes, pparams,
                            tile_v=TILE_V):
    v = verts.shape[0]
    tm = tk = min(tile_v, round_up(max(v, 1), MIN_TILE_V))
    vp = round_up(v, tm)

    # Padded (lane-dense) vertex features.
    x = jnp.zeros((vp, CP), jnp.float32).at[:v, :verts.shape[1]].set(verts)

    # Symmetric adjacency built directly in bf16 (0/1/2 exact); padded
    # rows/cols stay zero. No f32 intermediate copy.
    adj = jnp.zeros((vp, vp), jnp.bfloat16)
    adj = adj.at[edges[:, 0], edges[:, 1]].add(jnp.bfloat16(1.0))
    adj = adj.at[edges[:, 1], edges[:, 0]].add(jnp.bfloat16(1.0))

    # Per-row-tile table of non-zero adjacency k-tiles (block-sparse skip).
    n_i, n_k = vp // tm, vp // tk
    tile_nnz = jnp.any((adj != 0).reshape(n_i, tm, n_k, tk), axis=(1, 3))
    tile_cnt = jnp.sum(tile_nnz, axis=1).astype(jnp.int32)
    order = jnp.argsort(jnp.logical_not(tile_nnz).astype(jnp.int32),
                        axis=1, stable=True).astype(jnp.int32)
    # Concrete max active tiles per row (eager). Under jit, pass n_k instead.
    n_k_active = max(int(jax.device_get(jnp.max(tile_cnt))), 1)
    tile_tbl = order[:, :n_k_active].reshape(-1)    # flat 1-D SMEM table

    # Per-mesh mean-pooling matrix; batch dim padded to a sublane multiple,
    # empty meshes guarded against divide-by-zero.
    b8 = max(round_up(num_meshes, 8), 8)
    mesh_pad = jnp.full((vp,), -1, jnp.int32).at[:v].set(mesh_idx)
    one_hot = (mesh_pad[None, :] ==
               jnp.arange(b8)[:, None]).astype(jnp.float32)
    counts = jnp.maximum(jnp.sum(one_hot, axis=1, keepdims=True), 1.0)
    pool_mat = one_hot / counts

    layers = pparams['gconv']
    h0f, h1b = xw01(x, layers[0]['w01'], layers[0]['b01'], tm)
    out_pad = None
    for li, layer in enumerate(layers):
        pre, stats_part = agg_stats(tile_cnt, tile_tbl, adj, h1b, h0f,
                                    tm, tk, v, n_k_active)
        stats = jnp.sum(stats_part, axis=0)          # tiny (2, CP) reduction
        if li + 1 < len(layers):
            nxt = layers[li + 1]
            h0f, h1b = bn_relu_xw01(pre, stats, layer['gamma'], layer['beta'],
                                    nxt['w01'], nxt['b01'], v, tm)
        else:
            out_pad = bn_relu_pool_heads(pre, stats, layer['gamma'],
                                         layer['beta'], pool_mat, pparams,
                                         v, tm)

    logits = out_pad[:num_meshes]                    # (B, 128) lane-dense
    return [logits[:, 0:3], logits[:, 3:5], logits[:, 5:9], logits[:, 9:14]]


# ----------------------------------------------------------------------------
# Pure-JAX reference (mirrors the bf16 adjacency/h1/pre casts and the clamped
# E[x^2]-mean^2 variance so the comparison isolates kernel-plumbing errors).
# ----------------------------------------------------------------------------
def reference_forward(verts, edges, mesh_idx, num_meshes, params):
    hp = lax.Precision.HIGHEST
    v = verts.shape[0]
    adj = jnp.zeros((v, v), jnp.float32)
    adj = adj.at[edges[:, 0], edges[:, 1]].add(1.0)
    adj = adj.at[edges[:, 1], edges[:, 0]].add(1.0)
    adj_bf16 = adj.astype(jnp.bfloat16)

    h = verts
    for (w0, b0, w1, b1, gamma, beta) in params['gconv']:
        h0 = jnp.dot(h, w0, precision=hp) + b0
        h1 = (jnp.dot(h, w1, precision=hp) + b1).astype(jnp.bfloat16)
        pre = h0 + jnp.dot(adj_bf16, h1, preferred_element_type=jnp.float32)
        mean = jnp.mean(pre, axis=0, keepdims=True)
        var = jnp.maximum(jnp.mean(pre * pre, axis=0, keepdims=True)
                          - mean * mean, 0.0)
        pre_b = pre.astype(jnp.bfloat16).astype(jnp.float32)  # bf16 round trip
        h = jnp.maximum((pre_b - mean) * lax.rsqrt(var + BN_EPS) * gamma + beta,
                        0.0)

    one_hot = (mesh_idx[None, :] ==
               jnp.arange(num_meshes)[:, None]).astype(jnp.float32)
    pool = one_hot / jnp.maximum(jnp.sum(one_hot, axis=1, keepdims=True), 1.0)
    pooled = jnp.dot(pool, h, precision=hp)
    feat = jnp.maximum(jnp.dot(pooled, params['fc1_w'], precision=hp)
                       + params['fc1_b'], 0.0)

    def head(n):
        t = jnp.maximum(jnp.dot(feat, params[f'{n}1_w'], precision=hp)
                        + params[f'{n}1_b'], 0.0)
        return jnp.dot(t, params[f'{n}2_w'], precision=hp) + params[f'{n}2_b']

    return [head('style'), head('sem'), head('func'), head('aes')]


if __name__ == "__main__":
    key = jax.random.PRNGKey(0)

    # Synthetic "mesh batch": 2 meshes, 16 vertices each, 3 input feats (xyz).
    num_meshes = 2
    verts_per_mesh = 16
    input_dim = 3
    hidden_dims = [32, 64]
    V = num_meshes * verts_per_mesh

    key, kverts, kparams = jax.random.split(key, 3)
    verts = jax.random.normal(kverts, (V, input_dim), dtype=jnp.float32)

    # Ring connectivity within each mesh (undirected edge list, packed ids).
    edge_list = []
    for m in range(num_meshes):
        base = m * verts_per_mesh
        for i in range(verts_per_mesh):
            edge_list.append((base + i, base + (i + 1) % verts_per_mesh))
    edges = jnp.array(edge_list, dtype=jnp.int32)

    mesh_idx = jnp.repeat(jnp.arange(num_meshes, dtype=jnp.int32),
                          verts_per_mesh)

    dims = [input_dim] + hidden_dims
    params = init_params(kparams, dims)
    pparams = prepare_params(params)

    outs = graph_conv_clf3_forward(verts, edges, mesh_idx, num_meshes, pparams)
    outs = jax.block_until_ready(outs)

    refs = reference_forward(verts, edges, mesh_idx, num_meshes, params)
    for o, r in zip(outs, refs):
        assert o.shape == r.shape, (o.shape, r.shape)
        assert jnp.allclose(o, r, atol=2e-5, rtol=1e-2), (o, r)

    print("KERNEL_OK")
</pallas_src>

<mosaic_0001>
module attributes {stable_mosaic.version = 11 : i64} {
  func.func @xw01_kernel(%arg0: i32, %arg1: memref<256x128xf32, #tpu.memory_space<vmem>>, %arg2: memref<128x256xf32, #tpu.memory_space<vmem>>, %arg3: memref<1x256xf32, #tpu.memory_space<vmem>>, %arg4: memref<256x128xf32, #tpu.memory_space<vmem>>, %arg5: memref<256x128xbf16, #tpu.memory_space<vmem>>) attributes {dimension_semantics = [#tpu.dimension_semantics<parallel>], iteration_bounds = array<i64: 1>, scalar_prefetch = 0 : i64, scratch_operands = 0 : i64, tpu.core_type = #tpu.core_type<tc>, window_params = [{transform_indices = @transform_0, window_bounds = array<i64: 256, 128>}, {pipeline_mode = #tpu.pipeline_mode<synchronous>, transform_indices = @transform_1, window_bounds = array<i64: 128, 256>}, {pipeline_mode = #tpu.pipeline_mode<synchronous>, transform_indices = @transform_2, window_bounds = array<i64: 1, 256>}, {transform_indices = @transform_3, window_bounds = array<i64: 256, 128>}, {transform_indices = @transform_4, window_bounds = array<i64: 256, 128>}]} {
    %c0 = arith.constant 0 : index
    %c0_0 = arith.constant 0 : index
    %0 = vector.load %arg1[%c0, %c0_0] : memref<256x128xf32, #tpu.memory_space<vmem>>, vector<256x128xf32>
    %c0_1 = arith.constant 0 : index
    %c0_2 = arith.constant 0 : index
    %1 = vector.load %arg2[%c0_1, %c0_2] : memref<128x256xf32, #tpu.memory_space<vmem>>, vector<128x256xf32>
    %cst = arith.constant dense<0.000000e+00> : vector<256x256xf32>
    %2 = tpu.matmul %0, %1, %cst {dimension_numbers = #tpu.dot_dimension_numbers<[1], [0], [0], [1], [0, 0, 1, 1], [], []>} : vector<256x128xf32>, vector<128x256xf32>, vector<256x256xf32> -> vector<256x256xf32>
    %c0_3 = arith.constant 0 : index
    %c0_4 = arith.constant 0 : index
    %3 = vector.load %arg3[%c0_3, %c0_4] : memref<1x256xf32, #tpu.memory_space<vmem>>, vector<1x256xf32>
    %4 = vector.broadcast %3 : vector<1x256xf32> to vector<256x256xf32>
    %5 = arith.addf %2, %4 : vector<256x256xf32>
    %6 = vector.extract_strided_slice %5 {offsets = [0, 0], sizes = [256, 128], strides = [1, 1]} : vector<256x256xf32> to vector<256x128xf32>
    %c0_5 = arith.constant 0 : index
    %c0_6 = arith.constant 0 : index
    %7 = vector.load %arg4[%c0_5, %c0_6] : memref<256x128xf32, #tpu.memory_space<vmem>>, vector<256x128xf32>
    tpu.vector_store %arg4[%c0_5, %c0_6], %6 {strides = array<i32>} : memref<256x128xf32, #tpu.memory_space<vmem>>, vector<256x128xf32>,
    %8 = vector.extract_strided_slice %5 {offsets = [0, 128], sizes = [256, 128], strides = [1, 1]} : vector<256x256xf32> to vector<256x128xf32>
    %9 = arith.truncf %8 : vector<256x128xf32> to vector<256x128xbf16>
    %c0_7 = arith.constant 0 : index
    %c0_8 = arith.constant 0 : index
    %10 = vector.load %arg5[%c0_7, %c0_8] : memref<256x128xbf16, #tpu.memory_space<vmem>>, vector<256x128xbf16>
    tpu.vector_store %arg5[%c0_7, %c0_8], %9 {strides = array<i32>} : memref<256x128xbf16, #tpu.memory_space<vmem>>, vector<256x128xbf16>,
    return
  }
  func.func @transform_0(%arg0: i32) -> (i32, i32) {
    %c0_i32 = arith.constant 0 : i32
    %c0_i32_0 = arith.constant 0 : i32
    return %arg0, %c0_i32 : i32, i32
  }
  func.func @transform_1(%arg0: i32) -> (i32, i32) {
    %c0_i32 = arith.constant 0 : i32
    %c0_i32_0 = arith.constant 0 : i32
    %c0_i32_1 = arith.constant 0 : i32
    return %c0_i32, %c0_i32_0 : i32, i32
  }
  func.func @transform_2(%arg0: i32) -> (i32, i32) {
    %c0_i32 = arith.constant 0 : i32
    %c0_i32_0 = arith.constant 0 : i32
    %c0_i32_1 = arith.constant 0 : i32
    return %c0_i32, %c0_i32_0 : i32, i32
  }
  func.func @transform_3(%arg0: i32) -> (i32, i32) {
    %c0_i32 = arith.constant 0 : i32
    %c0_i32_0 = arith.constant 0 : i32
    return %arg0, %c0_i32 : i32, i32
  }
  func.func @transform_4(%arg0: i32) -> (i32, i32) {
    %c0_i32 = arith.constant 0 : i32
    %c0_i32_0 = arith.constant 0 : i32
    return %arg0, %c0_i32 : i32, i32
  }
}

</mosaic_0001>

<bundles_post_ra>
// kernel: tpu_custom_call.1
= control target key start
LH: loop header
LB: loop body
LE: loop exit
PB: predicated region body
PF: predicated region fallthrough
CT: control target
= control target key end

     0   :  { %10 = vsyncpa [#allocation3], 0  ;;  %s1163_s0 = inlined_call_operand.hbm [shape: f32[256,128], index: 0, kind: input, shape index: {}]   ;;  %s1164_s1 = inlined_call_operand.hbm [shape: f32[128,256], index: 1, kind: input, shape index: {}]   ;;  %s1165_s2 = inlined_call_operand.hbm [shape: f32[1,256], index: 2, kind: input, shape index: {}]   ;;  %s1166_s3 = inlined_call_operand.hbm [shape: f32[256,128], index: 3, kind: output, shape index: {0}]   ;;  %s1167_s4 = inlined_call_operand.hbm [shape: bf16[256,128], index: 4, kind: output, shape index: {1}]  }
   0x1   :  { %11 = vsyncpa [#allocation6], 0 }
   0x2   :  { %12 = vsyncpa [#allocation4], 0 }
   0x3   :  { %13 = vsyncpa [#allocation10], 0  ;;  %s953_s15 = smov [#allocation5]   ;;  %s835_s19 = scalar_lea.hbm %s1164_s1, 4096 }
   0x4   :  { %s31_s16 = sshll.u32 %s953_s15, 4  ;;  %p836_p0 = scmp.ne.s32.totalorder %s1164_s1, %s835_s19  ;;  %s32_s16 = int_to_ptr.vmem [resolvable:$true] %s31_s16 }
   0x5   :  { %p839_p1 = scmp.lt.u32.totalorder %s835_s19, %s1164_s1 }
   0x7   :  { %p841_p2 = pnand %p839_p1, %p836_p0 }
   0x9   :  { %844 = shalt.err (!%p841_p2)
}
   0xa   :  { %s845_s24 = scalar_lea.vmem %s32_s16, 4096  ;;  %p850_p4 = scmp.lt.s32.totalorder %s32_s16, %s32_s16 }
   0xb   :  { %p846_p3 = scmp.ne.s32.totalorder %s32_s16, %s845_s24  ;;  %p851_p5 = scmp.lt.s32.totalorder %s845_s24, %s845_s24 }
   0xd   :  { %p852_p6 = por %p851_p5, %p850_p4 }
   0xf   :  { %p853_p7 = pnand %p852_p6, %p846_p3 }
  0x11   :  { %856 = shalt.err (!%p853_p7)
}
  0x12   :  { %s954_s25 = smov 256   ;;  %s955_s26 = smov 16  }
  0x13   :  { %37 = dma.hbm_to_vmem [thread:$0]  %s1164_s1, 4096, %s32_s16, [#allocation6], %s954_s25, %s954_s25, %s955_s26  }
  0x14   :  { %s956_s29 = smov [#allocation2]   ;;  %s857_s7 = scalar_lea.hbm %s1163_s0, 4096 }
  0x15   :  { %s19_s30 = sshll.u32 %s956_s29, 4  ;;  %p858_p8 = scmp.ne.s32.totalorder %s1163_s0, %s857_s7  ;;  %s20_s30 = int_to_ptr.vmem [resolvable:$true] %s19_s30 }
  0x16   :  { %p861_p9 = scmp.lt.u32.totalorder %s857_s7, %s1163_s0 }
  0x18   :  { %p863_p10 = pnand %p861_p9, %p858_p8 }
  0x1a   :  { %866 = shalt.err (!%p863_p10)
}
  0x1b   :  { %s867_s12 = scalar_lea.vmem %s20_s30, 4096  ;;  %p872_p12 = scmp.lt.s32.totalorder %s20_s30, %s20_s30 }
  0x1c   :  { %p868_p11 = scmp.ne.s32.totalorder %s20_s30, %s867_s12  ;;  %p873_p13 = scmp.lt.s32.totalorder %s867_s12, %s867_s12 }
  0x1e   :  { %p874_p0 = por %p873_p13, %p872_p12 }
  0x20   :  { %p875_p1 = pnand %p874_p0, %p868_p11 }
  0x22   :  { %878 = shalt.err (!%p875_p1)
}
  0x23   :  { %s957_s1 = smov 128   ;;  %s958_s13 = smov 8  }
  0x24   :  { %25 = dma.hbm_to_vmem [thread:$0]  %s1163_s0, 4096, %s20_s30, [#allocation3], %s957_s1, %s957_s1, %s958_s13  }
  0x25   :  { %s959_s16 = smov [#allocation7]   ;;  %s879_s20 = scalar_lea.hbm %s1165_s2, 32 }
  0x26   :  { %s44_s17 = sshll.u32 %s959_s16, 4  ;;  %p880_p2 = scmp.ne.s32.totalorder %s1165_s2, %s879_s20  ;;  %s45_s17 = int_to_ptr.vmem [resolvable:$true] %s44_s17 }
  0x27   :  { %p883_p3 = scmp.lt.u32.totalorder %s879_s20, %s1165_s2 }
  0x29   :  { %p885_p4 = pnand %p883_p3, %p880_p2 }
  0x2b   :  { %888 = shalt.err (!%p885_p4)
}
  0x2c   :  { %s889_s25 = scalar_lea.vmem %s45_s17, 32  ;;  %p894_p6 = scmp.lt.s32.totalorder %s45_s17, %s45_s17 }
  0x2d   :  { %p890_p5 = scmp.ne.s32.totalorder %s45_s17, %s889_s25  ;;  %p895_p7 = scmp.lt.s32.totalorder %s889_s25, %s889_s25 }
  0x2f   :  { %p896_p8 = por %p895_p7, %p894_p6 }
  0x31   :  { %p897_p9 = pnand %p896_p8, %p890_p5 }
  0x33   :  { %900 = shalt.err (!%p897_p9)
}
  0x34   :  { %47 = dma.hbm_to_vmem [thread:$0]  %s1165_s2, 32, %s45_s17, [#allocation6]  }
  0x35   :  { %945 = dma.done.wait [#allocation3], 4096  }
  0x36   :  { %946 = vsyncadd [#allocation3], 4294963200 }
  0x37   :  { %947 = dma.done.wait [#allocation6], 4128  }
  0x38   :  { %948 = vsyncadd [#allocation6], 4294963168  ;;  %v960_v0 = vmov 0.0   ;;  %v90_v1 = vld [vmem:[#allocation5 + $0x8] sm:$0xff]  ;;  %v92_v2 = vld [vmem:[#allocation5 + $0x18] sm:$0xff]  ;;  %s961_s2 = smov [#allocation8]  }
  0x39   :  { %197 = vmatprep.mubr.f32.mxu0 %v960_v0  ;;  %293 = vmatprep.mubr.f32.mxu1 %v960_v0  ;;  %v89_v3 = vld [vmem:[#allocation5] sm:$0xff]  ;;  %v775_v4 = vpack.c.bf16 %v92_v2, %v90_v1  ;;  %v91_v5 = vld [vmem:[#allocation5 + $0x10] sm:$0xff]  ;;  %v94_v6 = vld [vmem:[#allocation5 + $0x28] sm:$0xff]  ;;  %s587_s27 = sshll.u32 %s961_s2, 4  ;;  %s962_s28 = smov [#allocation9]   ;;  %s588_s27 = int_to_ptr.vmem [resolvable:$true] %s587_s27 }
  0x3a   :  { %v96_v7 = vld [vmem:[#allocation5 + $0x38] sm:$0xff]  ;;  %v777_v8 = vpack.c.bf16 %v91_v5, %v89_v3  ;;  %v93_v10 = vld [vmem:[#allocation5 + $0x20] sm:$0xff]  ;;  %v95_v11 = vld [vmem:[#allocation5 + $0x30] sm:$0xff]  ;;  %s599_s29 = sshll.u32 %s962_s28, 4  ;;  %s901_s30 = scalar_lea.vmem %s588_s27, 4096  ;;  %s1129_s29 = int_to_ptr.vmem [resolvable:$true] %s599_s29 }
  0x3b   :  { %v779_v9 = vpack.c.bf16 %v96_v7, %v94_v6  ;;  %v98_v12 = vld [vmem:[#allocation5 + $0x48] sm:$0xff]  ;;  %776 = vmatprep.subr.bf16.mxu0 %v775_v4  ;;  %807 = vmatprep.subr.bf16.mxu1 %v775_v4  ;;  %v100_v13 = vld [vmem:[#allocation5 + $0x58] sm:$0xff]  ;;  %v781_v14 = vpack.c.bf16 %v95_v11, %v93_v10  ;;  %v97_v16 = vld [vmem:[#allocation5 + $0x40] sm:$0xff]  ;;  %p902_p10 = scmp.ne.s32.totalorder %s588_s27, %s901_s30  ;;  %p906_p11 = scmp.lt.s32.totalorder %s588_s27, %s588_s27 }
  0x3c   :  { %778 = vmatpush1.bf16.msra.mxu0 %v777_v8  ;;  %815 = vmatpush1.bf16.msra.mxu1 %v777_v8  ;;  %v783_v15 = vpack.c.bf16 %v100_v13, %v98_v12  ;;  %v99_v17 = vld [vmem:[#allocation5 + $0x50] sm:$0xff]  ;;  %v102_v18 = vld [vmem:[#allocation5 + $0x68] sm:$0xff]  ;;  %v104_v19 = vld [vmem:[#allocation5 + $0x78] sm:$0xff]  ;;  %p907_p12 = scmp.lt.s32.totalorder %s901_s30, %s901_s30 }
  0x3d   :  { %780 = vmatprep.subr.bf16.mxu0 %v779_v9  ;;  %808 = vmatprep.subr.bf16.mxu1 %v779_v9  ;;  %v785_v20 = vpack.c.bf16 %v99_v17, %v97_v16  ;;  %v787_v21 = vpack.c.bf16 %v104_v19, %v102_v18  ;;  %v101_v22 = vld [vmem:[#allocation5 + $0x60] sm:$0xff]  ;;  %v103_v23 = vld [vmem:[#allocation5 + $0x70] sm:$0xff]  ;;  %v106_v24 = vld [vmem:[#allocation5 + $0x88] sm:$0xff]  ;;  %v123_v18 = vlaneseq }
  0x3e   :  { %v108_v25 = vld [vmem:[#allocation5 + $0x98] sm:$0xff]  ;;  %v789_v26 = vpack.c.bf16 %v103_v23, %v101_v22  ;;  %v105_v28 = vld [vmem:[#allocation5 + $0x80] sm:$0xff]  ;;  %v107_v29 = vld [vmem:[#allocation5 + $0x90] sm:$0xff]  ;;  %p908_p13 = por %p907_p12, %p906_p11 }
  0x3f   :  { %v791_v27 = vpack.c.bf16 %v108_v25, %v106_v24  ;;  %v110_v30 = vld [vmem:[#allocation5 + $0xa8] sm:$0xff]  ;;  %v112_v31 = vld [vmem:[#allocation5 + $0xb8] sm:$0xff]  ;;  %v793_v32 = vpack.c.bf16 %v107_v29, %v105_v28  ;;  %v109_v34 = vld [vmem:[#allocation5 + $0xa0] sm:$0xff]  ;;  %v124_v19 = vshrl.u32 %v123_v18, 7 }
  0x40   :  { %782 = vmatpush1.bf16.msra.mxu0 %v781_v14  ;;  %816 = vmatpush1.bf16.msra.mxu1 %v781_v14  ;;  %v795_v33 = vpack.c.bf16 %v112_v31, %v110_v30  ;;  %v111_v35 = vld [vmem:[#allocation5 + $0xb0] sm:$0xff]  ;;  %v114_v36 = vld [vmem:[#allocation5 + $0xc8] sm:$0xff]  ;;  %v116_v37 = vld [vmem:[#allocation5 + $0xd8] sm:$0xff]  ;;  %p909_p0 = pnand %p908_p13, %p902_p10 }
  0x41   :  { %784 = vmatprep.subr.bf16.mxu0 %v783_v15  ;;  %809 = vmatprep.subr.bf16.mxu1 %v783_v15  ;;  %v797_v38 = vpack.c.bf16 %v111_v35, %v109_v34  ;;  %v799_v39 = vpack.c.bf16 %v116_v37, %v114_v36  ;;  %v113_v40 = vld [vmem:[#allocation5 + $0xc0] sm:$0xff]  ;;  %v115_v41 = vld [vmem:[#allocation5 + $0xd0] sm:$0xff]  ;;  %v118_v42 = vld [vmem:[#allocation5 + $0xe8] sm:$0xff]  ;;  %v129_v23 = vsub.s32 1, %v124_v19 }
  0x42   :  { %v120_v43 = vld [vmem:[#allocation5 + $0xf8] sm:$0xff]  ;;  %v801_v44 = vpack.c.bf16 %v115_v41, %v113_v40  ;;  %v117_v46 = vld [vmem:[#allocation5 + $0xe0] sm:$0xff]  ;;  %v119_v47 = vld [vmem:[#allocation5 + $0xf0] sm:$0xff] }
  0x43   :  { %v803_v45 = vpack.c.bf16 %v120_v43, %v118_v42  ;;  %v805_v48 = vpack.c.bf16 %v119_v47, %v117_v46  ;;  %v57_v49 = vld [vmem:[#allocation2] sm:$0xff]  ;;  %v58_v51 = vld [vmem:[#allocation2 + $0x8] sm:$0xff]  ;;  %v59_v53 = vld [vmem:[#allocation2 + $0x10] sm:$0xff] }
  0x44   :  { %786 = vmatpush1.bf16.msra.mxu0 %v785_v20  ;;  %817 = vmatpush1.bf16.msra.mxu1 %v785_v20  ;;  %v73_v50 = vld [vmem:[#allocation2 + $0x80] sm:$0xff]  ;;  %v74_v52 = vld [vmem:[#allocation2 + $0x88] sm:$0xff]  ;;  %v75_v54 = vld [vmem:[#allocation2 + $0x90] sm:$0xff]  ;;  %v125_v20 = vsub.s32 0, %v124_v19 }
  0x45   :  { %788 = vmatprep.subr.bf16.mxu0 %v787_v21  ;;  %810 = vmatprep.subr.bf16.mxu1 %v787_v21  ;;  %v60_v55 = vld [vmem:[#allocation2 + $0x18] sm:$0xff]  ;;  %v61_v57 = vld [vmem:[#allocation2 + $0x20] sm:$0xff]  ;;  %v62_v59 = vld [vmem:[#allocation2 + $0x28] sm:$0xff] }
  0x46   :  { %v76_v56 = vld [vmem:[#allocation2 + $0x98] sm:$0xff]  ;;  %v77_v58 = vld [vmem:[#allocation2 + $0xa0] sm:$0xff]  ;;  %v78_v60 = vld [vmem:[#allocation2 + $0xa8] sm:$0xff] }
  0x47   :  { %v63_v61 = vld [vmem:[#allocation2 + $0x30] sm:$0xff]  ;;  %v64_v63 = vld [vmem:[#allocation2 + $0x38] sm:$0xff]  ;;  %v65_v2 = vld [vmem:[#allocation2 + $0x40] sm:$0xff] }
  0x48   :  { %790 = vmatpush1.bf16.msra.mxu0 %v789_v26  ;;  %818 = vmatpush1.bf16.msra.mxu1 %v789_v26  ;;  %v79_v62 = vld [vmem:[#allocation2 + $0xb0] sm:$0xff]  ;;  %v80_v1 = vld [vmem:[#allocation2 + $0xb8] sm:$0xff]  ;;  %v81_v3 = vld [vmem:[#allocation2 + $0xc0] sm:$0xff] }
  0x49   :  { %792 = vmatprep.subr.bf16.mxu0 %v791_v27  ;;  %811 = vmatprep.subr.bf16.mxu1 %v791_v27  ;;  %v66_v4 = vld [vmem:[#allocation2 + $0x48] sm:$0xff]  ;;  %v67_v6 = vld [vmem:[#allocation2 + $0x50] sm:$0xff]  ;;  %v68_v8 = vld [vmem:[#allocation2 + $0x58] sm:$0xff] }
  0x4a   :  { %v82_v5 = vld [vmem:[#allocation2 + $0xc8] sm:$0xff]  ;;  %v83_v7 = vld [vmem:[#allocation2 + $0xd0] sm:$0xff]  ;;  %v84_v9 = vld [vmem:[#allocation2 + $0xd8] sm:$0xff] }
  0x4b   :  { %v69_v10 = vld [vmem:[#allocation2 + $0x60] sm:$0xff]  ;;  %v70_v12 = vld [vmem:[#allocation2 + $0x68] sm:$0xff]  ;;  %v71_v14 = vld [vmem:[#allocation2 + $0x70] sm:$0xff] }
  0x4c   :  { %794 = vmatpush1.bf16.msra.mxu0 %v793_v32  ;;  %819 = vmatpush1.bf16.msra.mxu1 %v793_v32  ;;  %v85_v11 = vld [vmem:[#allocation2 + $0xe0] sm:$0xff]  ;;  %v86_v13 = vld [vmem:[#allocation2 + $0xe8] sm:$0xff]  ;;  %v87_v15 = vld [vmem:[#allocation2 + $0xf0] sm:$0xff] }
  0x4d   :  { %796 = vmatprep.subr.bf16.mxu0 %v795_v33  ;;  %812 = vmatprep.subr.bf16.mxu1 %v795_v33  ;;  %v72_v16 = vld [vmem:[#allocation2 + $0x78] sm:$0xff]  ;;  %v121_v21 = vld [vmem:[#allocation7] sm:$0x3] }
  0x4e   :  { %v88_v17 = vld [vmem:[#allocation2 + $0xf8] sm:$0xff]  ;;  %v1061_v22 = vrot.slane %v121_v21, %v125_v20 }
  0x50   :  { %798 = vmatpush1.bf16.msra.mxu0 %v797_v38  ;;  %820 = vmatpush1.bf16.msra.mxu1 %v797_v38 }
  0x51   :  { %800 = vmatprep.subr.bf16.mxu0 %v799_v39  ;;  %813 = vmatprep.subr.bf16.mxu1 %v799_v39 }
  0x54   :  { %802 = vmatpush1.bf16.msra.mxu0 %v801_v44  ;;  %821 = vmatpush1.bf16.msra.mxu1 %v801_v44 }
  0x55   :  { %804 = vmatprep.subr.bf16.mxu0 %v803_v45  ;;  %814 = vmatprep.subr.bf16.mxu1 %v803_v45 }
  0x58   :  { %806 = vmatpush1.bf16.msra.mxu0 %v805_v48  ;;  %822 = vmatpush1.bf16.msra.mxu1 %v805_v48 }
  0x5b   :  { %198 = vmatmul.mubr.f32.vlgmr.msra.gmra.mrb[0].mxu0 %v57_v49  ;;  %294 = vmatmul.mubr.f32.vlgmr.msra.gmra.mrb[0].mxu1 %v73_v50 }
  0x5c   :  { %203 = vmatprep.mubr.f32.mxu0 %v960_v0  ;;  %299 = vmatprep.mubr.f32.mxu1 %v960_v0 }
  0x5f   :  { %204 = vmatmul.mubr.f32.gmra.mrb[2].mxu0 %v58_v51  ;;  %300 = vmatmul.mubr.f32.gmra.mrb[2].mxu1 %v74_v52 }
  0x60   :  { %209 = vmatprep.mubr.f32.mxu0 %v960_v0  ;;  %305 = vmatprep.mubr.f32.mxu1 %v960_v0 }
  0x63   :  { %210 = vmatmul.mubr.f32.gmra.mrb[4].mxu0 %v59_v53  ;;  %306 = vmatmul.mubr.f32.gmra.mrb[4].mxu1 %v75_v54 }
  0x64   :  { %215 = vmatprep.mubr.f32.mxu0 %v960_v0  ;;  %311 = vmatprep.mubr.f32.mxu1 %v960_v0 }
  0x67   :  { %216 = vmatmul.mubr.f32.gmra.mrb[6].mxu0 %v60_v55  ;;  %312 = vmatmul.mubr.f32.gmra.mrb[6].mxu1 %v76_v56 }
  0x68   :  { %221 = vmatprep.mubr.f32.mxu0 %v960_v0  ;;  %317 = vmatprep.mubr.f32.mxu1 %v960_v0 }
  0x6b   :  { %222 = vmatmul.mubr.f32.gmra.mrb[8].mxu0 %v61_v57  ;;  %318 = vmatmul.mubr.f32.gmra.mrb[8].mxu1 %v77_v58 }
  0x6c   :  { %227 = vmatprep.mubr.f32.mxu0 %v960_v0  ;;  %323 = vmatprep.mubr.f32.mxu1 %v960_v0 }
  0x6f   :  { %228 = vmatmul.mubr.f32.gmra.mrb[10].mxu0 %v62_v59  ;;  %324 = vmatmul.mubr.f32.gmra.mrb[10].mxu1 %v78_v60 }
  0x70   :  { %233 = vmatprep.mubr.f32.mxu0 %v960_v0  ;;  %329 = vmatprep.mubr.f32.mxu1 %v960_v0 }
  0x73   :  { %234 = vmatmul.mubr.f32.gmra.mrb[12].mxu0 %v63_v61  ;;  %330 = vmatmul.mubr.f32.gmra.mrb[12].mxu1 %v79_v62 }
  0x74   :  { %239 = vmatprep.mubr.f32.mxu0 %v960_v0  ;;  %335 = vmatprep.mubr.f32.mxu1 %v960_v0 }
  0x77   :  { %240 = vmatmul.mubr.f32.gmra.mrb[14].mxu0 %v64_v63  ;;  %336 = vmatmul.mubr.f32.gmra.mrb[14].mxu1 %v80_v1 }
  0x78   :  { %245 = vmatprep.mubr.f32.mxu0 %v960_v0  ;;  %341 = vmatprep.mubr.f32.mxu1 %v960_v0 }
  0x7b   :  { %246 = vmatmul.mubr.f32.gmra.mrb[16].mxu0 %v65_v2  ;;  %342 = vmatmul.mubr.f32.gmra.mrb[16].mxu1 %v81_v3 }
  0x7c   :  { %251 = vmatprep.mubr.f32.mxu0 %v960_v0  ;;  %347 = vmatprep.mubr.f32.mxu1 %v960_v0 }
  0x7f   :  { %252 = vmatmul.mubr.f32.gmra.mrb[18].mxu0 %v66_v4  ;;  %348 = vmatmul.mubr.f32.gmra.mrb[18].mxu1 %v82_v5 }
  0x80   :  { %257 = vmatprep.mubr.f32.mxu0 %v960_v0  ;;  %353 = vmatprep.mubr.f32.mxu1 %v960_v0 }
  0x83   :  { %258 = vmatmul.mubr.f32.gmra.mrb[20].mxu0 %v67_v6  ;;  %354 = vmatmul.mubr.f32.gmra.mrb[20].mxu1 %v83_v7 }
  0x84   :  { %263 = vmatprep.mubr.f32.mxu0 %v960_v0  ;;  %359 = vmatprep.mubr.f32.mxu1 %v960_v0 }
  0x87   :  { %264 = vmatmul.mubr.f32.gmra.mrb[22].mxu0 %v68_v8  ;;  %360 = vmatmul.mubr.f32.gmra.mrb[22].mxu1 %v84_v9 }
  0x88   :  { %269 = vmatprep.mubr.f32.mxu0 %v960_v0  ;;  %365 = vmatprep.mubr.f32.mxu1 %v960_v0 }
  0x8b   :  { %270 = vmatmul.mubr.f32.gmra.mrb[24].mxu0 %v69_v10  ;;  %366 = vmatmul.mubr.f32.gmra.mrb[24].mxu1 %v85_v11 }
  0x8c   :  { %275 = vmatprep.mubr.f32.mxu0 %v960_v0  ;;  %371 = vmatprep.mubr.f32.mxu1 %v960_v0 }
  0x8f   :  { %276 = vmatmul.mubr.f32.gmra.mrb[26].mxu0 %v70_v12  ;;  %372 = vmatmul.mubr.f32.gmra.mrb[26].mxu1 %v86_v13 }
  0x90   :  { %281 = vmatprep.mubr.f32.mxu0 %v960_v0  ;;  %377 = vmatprep.mubr.f32.mxu1 %v960_v0 }
  0x93   :  { %282 = vmatmul.mubr.f32.gmra.mrb[28].mxu0 %v71_v14  ;;  %378 = vmatmul.mubr.f32.gmra.mrb[28].mxu1 %v87_v15 }
  0x94   :  { %287 = vmatprep.mubr.f32.mxu0 %v960_v0  ;;  %383 = vmatprep.mubr.f32.mxu1 %v960_v0  ;;  %v1065_v0 = vrot.slane %v121_v21, %v129_v23 }
  0x97   :  { %288 = vmatmul.mubr.f32.gmra.mrb[30].mxu0 %v72_v16  ;;  %384 = vmatmul.mubr.f32.gmra.mrb[30].mxu1 %v88_v17 }
 0x12e   :  { %v199_v24 = vpop.f32.mrb[0].mxu0  ;;  %v295_v25 = vpop.f32.mrb[0].mxu1 }
 0x12f   :  { %v200_v26 = vadd.f32 %v199_v24, %v1061_v22  ;;  %v296_v27 = vadd.f32 %v295_v25, %v1061_v22  ;;  %v201_v28 = vpop.f32.mrb[1].mxu0  ;;  %v297_v29 = vpop.f32.mrb[1].mxu1 }
 0x130   :  { %v202_v36 = vadd.f32 %v201_v28, %v1065_v0  ;;  %v298_v37 = vadd.f32 %v297_v29, %v1065_v0 }
 0x131   :  { %390 = vst [vmem:[#allocation8] sm:$0xff] %v200_v26  ;;  %406 = vst [vmem:[#allocation8 + $0x80] sm:$0xff] %v296_v27 }
 0x132   :  { %v205_v30 = vpop.f32.mrb[2].mxu0  ;;  %v301_v31 = vpop.f32.mrb[2].mxu1 }
 0x133   :  { %v206_v32 = vadd.f32 %v205_v30, %v1061_v22  ;;  %v302_v33 = vadd.f32 %v301_v31, %v1061_v22  ;;  %v207_v34 = vpop.f32.mrb[3].mxu0  ;;  %v303_v35 = vpop.f32.mrb[3].mxu1 }
 0x134   :  { %v208_v38 = vadd.f32 %v207_v34, %v1065_v0  ;;  %v304_v39 = vadd.f32 %v303_v35, %v1065_v0 }
 0x135   :  { %391 = vst [vmem:[#allocation8 + $0x8] sm:$0xff] %v206_v32  ;;  %407 = vst [vmem:[#allocation8 + $0x88] sm:$0xff] %v302_v33 }
 0x136   :  { %v683_v40 = vpack.c.bf16 %v208_v38, %v202_v36  ;;  %v723_v41 = vpack.c.bf16 %v304_v39, %v298_v37  ;;  %v211_v42 = vpop.f32.mrb[4].mxu0  ;;  %v307_v43 = vpop.f32.mrb[4].mxu1 }
 0x137   :  { %v212_v44 = vadd.f32 %v211_v42, %v1061_v22  ;;  %v308_v45 = vadd.f32 %v307_v43, %v1061_v22  ;;  %v213_v46 = vpop.f32.mrb[5].mxu0  ;;  %v309_v47 = vpop.f32.mrb[5].mxu1 }
 0x138   :  { %684 = vst [vmem:[#allocation9] sm:$0xff] %v683_v40   ;;  %767 = vst [vmem:[#allocation9 + $0x40] sm:$0xff] %v723_v41   ;;  %v214_v54 = vadd.f32 %v213_v46, %v1065_v0  ;;  %v310_v55 = vadd.f32 %v309_v47, %v1065_v0 }
 0x139   :  { %392 = vst [vmem:[#allocation8 + $0x10] sm:$0xff] %v212_v44  ;;  %408 = vst [vmem:[#allocation8 + $0x90] sm:$0xff] %v308_v45 }
 0x13a   :  { %v217_v48 = vpop.f32.mrb[6].mxu0  ;;  %v313_v49 = vpop.f32.mrb[6].mxu1 }
 0x13b   :  { %v218_v50 = vadd.f32 %v217_v48, %v1061_v22  ;;  %v314_v51 = vadd.f32 %v313_v49, %v1061_v22  ;;  %v219_v52 = vpop.f32.mrb[7].mxu0  ;;  %v315_v53 = vpop.f32.mrb[7].mxu1 }
 0x13c   :  { %v220_v56 = vadd.f32 %v219_v52, %v1065_v0  ;;  %v316_v57 = vadd.f32 %v315_v53, %v1065_v0 }
 0x13d   :  { %393 = vst [vmem:[#allocation8 + $0x18] sm:$0xff] %v218_v50  ;;  %409 = vst [vmem:[#allocation8 + $0x98] sm:$0xff] %v314_v51 }
 0x13e   :  { %v688_v58 = vpack.c.bf16 %v220_v56, %v214_v54  ;;  %v728_v59 = vpack.c.bf16 %v316_v57, %v310_v55  ;;  %v223_v60 = vpop.f32.mrb[8].mxu0  ;;  %v319_v61 = vpop.f32.mrb[8].mxu1 }
 0x13f   :  { %v224_v62 = vadd.f32 %v223_v60, %v1061_v22  ;;  %v320_v63 = vadd.f32 %v319_v61, %v1061_v22  ;;  %v225_v1 = vpop.f32.mrb[9].mxu0  ;;  %v321_v2 = vpop.f32.mrb[9].mxu1 }
 0x140   :  { %760 = vst [vmem:[#allocation9 + $0x8] sm:$0xff] %v688_v58   ;;  %768 = vst [vmem:[#allocation9 + $0x48] sm:$0xff] %v728_v59   ;;  %v226_v9 = vadd.f32 %v225_v1, %v1065_v0  ;;  %v322_v10 = vadd.f32 %v321_v2, %v1065_v0 }
 0x141   :  { %394 = vst [vmem:[#allocation8 + $0x20] sm:$0xff] %v224_v62  ;;  %410 = vst [vmem:[#allocation8 + $0xa0] sm:$0xff] %v320_v63 }
 0x142   :  { %v229_v3 = vpop.f32.mrb[10].mxu0  ;;  %v325_v4 = vpop.f32.mrb[10].mxu1 }
 0x143   :  { %v230_v5 = vadd.f32 %v229_v3, %v1061_v22  ;;  %v326_v6 = vadd.f32 %v325_v4, %v1061_v22  ;;  %v231_v7 = vpop.f32.mrb[11].mxu0  ;;  %v327_v8 = vpop.f32.mrb[11].mxu1 }
 0x144   :  { %v232_v11 = vadd.f32 %v231_v7, %v1065_v0  ;;  %v328_v12 = vadd.f32 %v327_v8, %v1065_v0 }
 0x145   :  { %395 = vst [vmem:[#allocation8 + $0x28] sm:$0xff] %v230_v5  ;;  %411 = vst [vmem:[#allocation8 + $0xa8] sm:$0xff] %v326_v6 }
 0x146   :  { %v693_v13 = vpack.c.bf16 %v232_v11, %v226_v9  ;;  %v733_v14 = vpack.c.bf16 %v328_v12, %v322_v10  ;;  %v235_v15 = vpop.f32.mrb[12].mxu0  ;;  %v331_v16 = vpop.f32.mrb[12].mxu1 }
 0x147   :  { %v236_v17 = vadd.f32 %v235_v15, %v1061_v22  ;;  %v332_v18 = vadd.f32 %v331_v16, %v1061_v22  ;;  %v237_v19 = vpop.f32.mrb[13].mxu0  ;;  %v333_v20 = vpop.f32.mrb[13].mxu1 }
 0x148   :  { %761 = vst [vmem:[#allocation9 + $0x10] sm:$0xff] %v693_v13   ;;  %769 = vst [vmem:[#allocation9 + $0x50] sm:$0xff] %v733_v14   ;;  %v238_v28 = vadd.f32 %v237_v19, %v1065_v0  ;;  %v334_v29 = vadd.f32 %v333_v20, %v1065_v0 }
 0x149   :  { %396 = vst [vmem:[#allocation8 + $0x30] sm:$0xff] %v236_v17  ;;  %412 = vst [vmem:[#allocation8 + $0xb0] sm:$0xff] %v332_v18 }
 0x14a   :  { %v241_v21 = vpop.f32.mrb[14].mxu0  ;;  %v337_v23 = vpop.f32.mrb[14].mxu1 }
 0x14b   :  { %v242_v24 = vadd.f32 %v241_v21, %v1061_v22  ;;  %v338_v25 = vadd.f32 %v337_v23, %v1061_v22  ;;  %v243_v26 = vpop.f32.mrb[15].mxu0  ;;  %v339_v27 = vpop.f32.mrb[15].mxu1 }
 0x14c   :  { %v244_v30 = vadd.f32 %v243_v26, %v1065_v0  ;;  %v340_v31 = vadd.f32 %v339_v27, %v1065_v0 }
 0x14d   :  { %397 = vst [vmem:[#allocation8 + $0x38] sm:$0xff] %v242_v24  ;;  %413 = vst [vmem:[#allocation8 + $0xb8] sm:$0xff] %v338_v25 }
 0x14e   :  { %v698_v32 = vpack.c.bf16 %v244_v30, %v238_v28  ;;  %v738_v33 = vpack.c.bf16 %v340_v31, %v334_v29  ;;  %v247_v34 = vpop.f32.mrb[16].mxu0  ;;  %v343_v35 = vpop.f32.mrb[16].mxu1 }
 0x14f   :  { %v248_v36 = vadd.f32 %v247_v34, %v1061_v22  ;;  %v344_v37 = vadd.f32 %v343_v35, %v1061_v22  ;;  %v249_v38 = vpop.f32.mrb[17].mxu0  ;;  %v345_v39 = vpop.f32.mrb[17].mxu1 }
 0x150   :  { %762 = vst [vmem:[#allocation9 + $0x18] sm:$0xff] %v698_v32   ;;  %770 = vst [vmem:[#allocation9 + $0x58] sm:$0xff] %v738_v33   ;;  %v250_v46 = vadd.f32 %v249_v38, %v1065_v0  ;;  %v346_v47 = vadd.f32 %v345_v39, %v1065_v0 }
 0x151   :  { %398 = vst [vmem:[#allocation8 + $0x40] sm:$0xff] %v248_v36  ;;  %414 = vst [vmem:[#allocation8 + $0xc0] sm:$0xff] %v344_v37 }
 0x152   :  { %v253_v40 = vpop.f32.mrb[18].mxu0  ;;  %v349_v41 = vpop.f32.mrb[18].mxu1 }
 0x153   :  { %v254_v42 = vadd.f32 %v253_v40, %v1061_v22  ;;  %v350_v43 = vadd.f32 %v349_v41, %v1061_v22  ;;  %v255_v44 = vpop.f32.mrb[19].mxu0  ;;  %v351_v45 = vpop.f32.mrb[19].mxu1 }
 0x154   :  { %v256_v48 = vadd.f32 %v255_v44, %v1065_v0  ;;  %v352_v49 = vadd.f32 %v351_v45, %v1065_v0 }
 0x155   :  { %399 = vst [vmem:[#allocation8 + $0x48] sm:$0xff] %v254_v42  ;;  %415 = vst [vmem:[#allocation8 + $0xc8] sm:$0xff] %v350_v43 }
 0x156   :  { %v703_v50 = vpack.c.bf16 %v256_v48, %v250_v46  ;;  %v743_v51 = vpack.c.bf16 %v352_v49, %v346_v47  ;;  %v259_v52 = vpop.f32.mrb[20].mxu0  ;;  %v355_v53 = vpop.f32.mrb[20].mxu1 }
 0x157   :  { %v260_v54 = vadd.f32 %v259_v52, %v1061_v22  ;;  %v356_v55 = vadd.f32 %v355_v53, %v1061_v22  ;;  %v261_v56 = vpop.f32.mrb[21].mxu0  ;;  %v357_v57 = vpop.f32.mrb[21].mxu1 }
 0x158   :  { %763 = vst [vmem:[#allocation9 + $0x20] sm:$0xff] %v703_v50   ;;  %771 = vst [vmem:[#allocation9 + $0x60] sm:$0xff] %v743_v51   ;;  %v262_v1 = vadd.f32 %v261_v56, %v1065_v0  ;;  %v358_v2 = vadd.f32 %v357_v57, %v1065_v0 }
 0x159   :  { %400 = vst [vmem:[#allocation8 + $0x50] sm:$0xff] %v260_v54  ;;  %416 = vst [vmem:[#allocation8 + $0xd0] sm:$0xff] %v356_v55 }
 0x15a   :  { %v265_v58 = vpop.f32.mrb[22].mxu0  ;;  %v361_v59 = vpop.f32.mrb[22].mxu1 }
 0x15b   :  { %v266_v60 = vadd.f32 %v265_v58, %v1061_v22  ;;  %v362_v61 = vadd.f32 %v361_v59, %v1061_v22  ;;  %v267_v62 = vpop.f32.mrb[23].mxu0  ;;  %v363_v63 = vpop.f32.mrb[23].mxu1 }
 0x15c   :  { %v268_v3 = vadd.f32 %v267_v62, %v1065_v0  ;;  %v364_v4 = vadd.f32 %v363_v63, %v1065_v0 }
 0x15d   :  { %401 = vst [vmem:[#allocation8 + $0x58] sm:$0xff] %v266_v60  ;;  %417 = vst [vmem:[#allocation8 + $0xd8] sm:$0xff] %v362_v61 }
 0x15e   :  { %v708_v5 = vpack.c.bf16 %v268_v3, %v262_v1  ;;  %v748_v6 = vpack.c.bf16 %v364_v4, %v358_v2  ;;  %v271_v7 = vpop.f32.mrb[24].mxu0  ;;  %v367_v8 = vpop.f32.mrb[24].mxu1 }
 0x15f   :  { %v272_v9 = vadd.f32 %v271_v7, %v1061_v22  ;;  %v368_v10 = vadd.f32 %v367_v8, %v1061_v22  ;;  %v273_v11 = vpop.f32.mrb[25].mxu0  ;;  %v369_v12 = vpop.f32.mrb[25].mxu1 }
 0x160   :  { %764 = vst [vmem:[#allocation9 + $0x28] sm:$0xff] %v708_v5   ;;  %772 = vst [vmem:[#allocation9 + $0x68] sm:$0xff] %v748_v6   ;;  %v274_v19 = vadd.f32 %v273_v11, %v1065_v0  ;;  %v370_v20 = vadd.f32 %v369_v12, %v1065_v0 }
 0x161   :  { %402 = vst [vmem:[#allocation8 + $0x60] sm:$0xff] %v272_v9  ;;  %418 = vst [vmem:[#allocation8 + $0xe0] sm:$0xff] %v368_v10 }
 0x162   :  { %v277_v13 = vpop.f32.mrb[26].mxu0  ;;  %v373_v14 = vpop.f32.mrb[26].mxu1 }
 0x163   :  { %v278_v15 = vadd.f32 %v277_v13, %v1061_v22  ;;  %v374_v16 = vadd.f32 %v373_v14, %v1061_v22  ;;  %v279_v17 = vpop.f32.mrb[27].mxu0  ;;  %v375_v18 = vpop.f32.mrb[27].mxu1 }
 0x164   :  { %v280_v21 = vadd.f32 %v279_v17, %v1065_v0  ;;  %v376_v23 = vadd.f32 %v375_v18, %v1065_v0 }
 0x165   :  { %403 = vst [vmem:[#allocation8 + $0x68] sm:$0xff] %v278_v15  ;;  %419 = vst [vmem:[#allocation8 + $0xe8] sm:$0xff] %v374_v16 }
 0x166   :  { %v713_v24 = vpack.c.bf16 %v280_v21, %v274_v19  ;;  %v753_v25 = vpack.c.bf16 %v376_v23, %v370_v20  ;;  %v283_v26 = vpop.f32.mrb[28].mxu0  ;;  %v379_v27 = vpop.f32.mrb[28].mxu1 }
 0x167   :  { %v284_v28 = vadd.f32 %v283_v26, %v1061_v22  ;;  %v380_v29 = vadd.f32 %v379_v27, %v1061_v22  ;;  %v285_v30 = vpop.f32.mrb[29].mxu0  ;;  %v381_v31 = vpop.f32.mrb[29].mxu1 }
 0x168   :  { %765 = vst [vmem:[#allocation9 + $0x30] sm:$0xff] %v713_v24   ;;  %773 = vst [vmem:[#allocation9 + $0x70] sm:$0xff] %v753_v25   ;;  %v286_v38 = vadd.f32 %v285_v30, %v1065_v0  ;;  %v382_v39 = vadd.f32 %v381_v31, %v1065_v0 }
 0x169   :  { %404 = vst [vmem:[#allocation8 + $0x70] sm:$0xff] %v284_v28  ;;  %420 = vst [vmem:[#allocation8 + $0xf0] sm:$0xff] %v380_v29 }
 0x16a   :  { %v289_v32 = vpop.f32.mrb[30].mxu0  ;;  %v385_v33 = vpop.f32.mrb[30].mxu1 }
 0x16b   :  { %v290_v34 = vadd.f32 %v289_v32, %v1061_v22  ;;  %v386_v35 = vadd.f32 %v385_v33, %v1061_v22  ;;  %v291_v36 = vpop.f32.mrb[31].mxu0  ;;  %v387_v37 = vpop.f32.mrb[31].mxu1 }
 0x16c   :  { %v292_v40 = vadd.f32 %v291_v36, %v1065_v0  ;;  %v388_v41 = vadd.f32 %v387_v37, %v1065_v0 }
 0x16d   :  { %405 = vst [vmem:[#allocation8 + $0x78] sm:$0xff] %v290_v34  ;;  %421 = vst [vmem:[#allocation8 + $0xf8] sm:$0xff] %v386_v35 }
 0x16e   :  { %v718_v42 = vpack.c.bf16 %v292_v40, %v286_v38  ;;  %v758_v43 = vpack.c.bf16 %v388_v41, %v382_v39 }
 0x16f   :  { %912 = shalt.err (!%p909_p0)
}
 0x170   :  { %s913_s7 = scalar_lea.hbm %s1166_s3, 4096 }
 0x171   :  { %p914_p1 = scmp.ne.s32.totalorder %s1166_s3, %s913_s7  ;;  %p917_p2 = scmp.lt.u32.totalorder %s913_s7, %s1166_s3 }
 0x173   :  { %p919_p3 = pnand %p917_p2, %p914_p1 }
 0x175   :  { %922 = shalt.err (!%p919_p3)
}
 0x176   :  { %593 = dma.vmem_to_hbm [thread:$0]  %s588_s27, 4096, %s1166_s3, [#allocation4], %s957_s1, %s957_s1, %s958_s13   ;;  %766 = vst [vmem:[#allocation9 + $0x38] sm:$0xff] %v718_v42   ;;  %774 = vst [vmem:[#allocation9 + $0x78] sm:$0xff] %v758_v43  }
 0x177   :  { %s923_s15 = scalar_lea.vmem %s1129_s29, 2048  ;;  %p928_p5 = scmp.lt.s32.totalorder %s1129_s29, %s1129_s29 }
 0x178   :  { %p924_p4 = scmp.ne.s32.totalorder %s1129_s29, %s923_s15  ;;  %p929_p6 = scmp.lt.s32.totalorder %s923_s15, %s923_s15 }
 0x17a   :  { %p930_p7 = por %p929_p6, %p928_p5 }
 0x17c   :  { %p931_p8 = pnand %p930_p7, %p924_p4 }
 0x17e   :  { %934 = shalt.err (!%p931_p8)
}
 0x17f   :  { %s935_s18 = scalar_lea.hbm %s1167_s4, 2048 }
 0x180   :  { %p936_p9 = scmp.ne.s32.totalorder %s1167_s4, %s935_s18  ;;  %p939_p10 = scmp.lt.u32.totalorder %s935_s18, %s1167_s4 }
 0x182   :  { %p941_p11 = pnand %p939_p10, %p936_p9 }
 0x184   :  { %944 = shalt.err (!%p941_p11)
}
 0x185   :  { %s963_s1 = smov 64   ;;  %s964_s13 = smov 4  }
 0x186   :  { %605 = dma.vmem_to_hbm [thread:$0]  %s1129_s29, 2048, %s1167_s4, [#allocation10], %s963_s1, %s963_s1, %s964_s13  }
 0x187   :  { %949 = dma.done.wait [#allocation4], 4096  }
 0x188   :  { %950 = vsyncadd [#allocation4], 4294963200 }
 0x189   :  { %951 = dma.done.wait [#allocation10], 2048  }
 0x18a   :  { %952 = vsyncadd [#allocation10], 4294965248 }
 0x18b   :  { %612 = vsyncpa [#allocation3], 1 }
 0x18c   :  { %613 = vsyncpa [#allocation6], 1 }
 0x18d   :  { %614 = vsyncpa [#allocation4], 1 }
 0x18e   :  { %615 = vsyncpa [#allocation10], 1 }

</bundles_post_ra>
